<compile_context>
chip_gen: v7x
topology: tpu7x:2x2x1
jax: 0.10.0
libtpu: 0.0.40
codegen_flags: <defaults>
</compile_context>

<pallas_src>
import jax
import jax.numpy as jnp
import numpy as np
from jax.experimental import pallas as pl
from jax.experimental.pallas import tpu as pltpu


def se_gate_mul_kernel(s_ref, w_ref, b_ref, x_ref, o_ref, gate_ref):
    """One (batch, channel-tile) step of the SE gate-and-scale.

    s_ref:    (1, 1, Cin)   squeeze vector for this batch element
    w_ref:    (Cout, Cin)   1x1 conv weight (block index constant -> resident)
    b_ref:    (Cout, 1)     bias, channel-major
    x_ref:    (1, TC, HW)   feature-map tile (NCHW flattened)
    o_ref:    (1, TC, HW)   output tile
    gate_ref: (Cout, 1)     f32 VMEM scratch holding sigmoid(conv) gate
    """
    c = pl.program_id(1)
    tc = o_ref.shape[1]

    # Compute the gate once per batch element (first channel tile only).
    @pl.when(c == 0)
    def _():
        # 1x1 conv on a 1x1 spatial input == per-channel dot product:
        # (Cout, Cin) * (1, Cin) summed over Cin -> (Cout, 1).
        # Pure VPU multiply + XLU reduce; off the per-tile critical path.
        prod = w_ref[...] * s_ref[0]                       # (Cout, Cin)
        g = jnp.sum(prod, axis=1, keepdims=True)           # (Cout, 1)
        gate_ref[...] = jax.nn.sigmoid(g + b_ref[...])     # EUP sigmoid

    # Broadcast-multiply this channel tile by its per-channel gate.
    start = pl.multiple_of(c * tc, 8)
    gate = gate_ref[pl.ds(start, tc), :]                   # (TC, 1)
    o_ref[...] = (x_ref[...] * gate[None, :, :]).astype(o_ref.dtype)


def se_conv_sigmoid_mul(x146_nchw, x143_nchw, weight, bias, *, tc=80):
    """Exact equivalent of the PyTorch module's forward.

    x146_nchw: (N, Cin, 1, 1) float32   squeeze input
    x143_nchw: (N, Cout, H, W) float32  feature map
    weight:    (Cout, Cin, 1, 1) float32
    bias:      (Cout,) float32
    returns:   (N, Cout, H, W) float32
    """
    N, Cin, _, _ = x146_nchw.shape
    _, Cout, H, W = x143_nchw.shape
    HW = H * W
    assert Cout % tc == 0 and tc % 8 == 0

    # Glue reshapes only — all contiguous (no transposes, no extra HBM pass).
    s = x146_nchw.reshape(N, 1, Cin)       # (N, 1, Cin)
    w = weight.reshape(Cout, Cin)          # (Cout, Cin)  (no transpose needed)
    b = bias.reshape(Cout, 1)              # (Cout, 1)    channel-major
    x = x143_nchw.reshape(N, Cout, HW)     # (N, Cout, HW) — NCHW kept

    out = pl.pallas_call(
        se_gate_mul_kernel,
        out_shape=jax.ShapeDtypeStruct((N, Cout, HW), x143_nchw.dtype),
        grid_spec=pltpu.PrefetchScalarGridSpec(
            num_scalar_prefetch=0,
            grid=(N, Cout // tc),
            in_specs=[
                pl.BlockSpec((1, 1, Cin), lambda n, c: (n, 0, 0)),   # s
                pl.BlockSpec((Cout, Cin), lambda n, c: (0, 0)),      # w
                pl.BlockSpec((Cout, 1), lambda n, c: (0, 0)),        # b
                pl.BlockSpec((1, tc, HW), lambda n, c: (n, c, 0)),   # x
            ],
            out_specs=pl.BlockSpec((1, tc, HW), lambda n, c: (n, c, 0)),
            scratch_shapes=[pltpu.VMEM((Cout, 1), jnp.float32)],
        ),
        compiler_params=pltpu.CompilerParams(
            dimension_semantics=("parallel", "arbitrary")),
    )(s, w, b, x)

    # Free contiguous reshape back to NCHW.
    return out.reshape(N, Cout, H, W)


if __name__ == "__main__":
    key = jax.random.PRNGKey(0)
    k1, k2, k3, k4 = jax.random.split(key, 4)

    N, Cin, Cout, H, W = 1, 80, 320, 14, 14

    # Deterministic synthetic inputs / parameters (module shapes).
    x146 = jax.random.normal(k1, (N, Cin, 1, 1), dtype=jnp.float32)
    x143 = jax.random.normal(k2, (N, Cout, H, W), dtype=jnp.float32)
    weight = jax.random.normal(k3, (Cout, Cin, 1, 1), dtype=jnp.float32) * 0.05
    bias = jax.random.normal(k4, (Cout,), dtype=jnp.float32) * 0.05

    out = se_conv_sigmoid_mul(x146, x143, weight, bias)
    out = jax.block_until_ready(out)

    # Plain-JAX reference (1x1 conv == matmul), full-precision dot.
    s2d = x146.reshape(N, Cin)
    w2d = weight.reshape(Cout, Cin)
    gate = jax.nn.sigmoid(
        jnp.einsum("ni,oi->no", s2d, w2d,
                   precision=jax.lax.Precision.HIGHEST) + bias[None, :])
    ref = gate.reshape(N, Cout, 1, 1) * x143

    assert out.shape == (N, Cout, H, W)
    np.testing.assert_allclose(np.asarray(out), np.asarray(ref),
                               rtol=1e-5, atol=1e-5)
    print("KERNEL_OK")
</pallas_src>

<mosaic_0001>
module attributes {stable_mosaic.version = 11 : i64} {
  func.func @se_gate_mul_kernel(%arg0: i32, %arg1: i32, %arg2: memref<1x1x80xf32, #tpu.memory_space<vmem>>, %arg3: memref<320x80xf32, #tpu.memory_space<vmem>>, %arg4: memref<320x1xf32, #tpu.memory_space<vmem>>, %arg5: memref<1x80x196xf32, #tpu.memory_space<vmem>>, %arg6: memref<1x80x196xf32, #tpu.memory_space<vmem>>, %arg7: memref<320x1xf32, #tpu.memory_space<vmem>>) attributes {dimension_semantics = [#tpu.dimension_semantics<parallel>, #tpu.dimension_semantics<arbitrary>], iteration_bounds = array<i64: 1, 4>, scalar_prefetch = 0 : i64, scratch_operands = 1 : i64, tpu.core_type = #tpu.core_type<tc>, window_params = [{transform_indices = @transform_0, window_bounds = array<i64: 1, 1, 80>}, {pipeline_mode = #tpu.pipeline_mode<synchronous>, transform_indices = @transform_1, window_bounds = array<i64: 320, 80>}, {pipeline_mode = #tpu.pipeline_mode<synchronous>, transform_indices = @transform_2, window_bounds = array<i64: 320, 1>}, {transform_indices = @transform_3, window_bounds = array<i64: 1, 80, 196>}, {transform_indices = @transform_4, window_bounds = array<i64: 1, 80, 196>}]} {
    %c0_i32 = arith.constant 0 : i32
    %0 = arith.cmpi eq, %arg1, %c0_i32 : i32
    %1 = arith.extui %0 : i1 to i32
    %c0_i32_0 = arith.constant 0 : i32
    %2 = arith.cmpi ne, %1, %c0_i32_0 : i32
    scf.if %2 {
      %c0_7 = arith.constant 0 : index
      %c0_8 = arith.constant 0 : index
      %12 = vector.load %arg3[%c0_7, %c0_8] : memref<320x80xf32, #tpu.memory_space<vmem>>, vector<320x80xf32>
      %c0_9 = arith.constant 0 : index
      %c0_10 = arith.constant 0 : index
      %c0_11 = arith.constant 0 : index
      %13 = vector.load %arg2[%c0_9, %c0_10, %c0_11] : memref<1x1x80xf32, #tpu.memory_space<vmem>>, vector<1x1x80xf32>
      %14 = vector.shape_cast %13 : vector<1x1x80xf32> to vector<1x80xf32>
      %15 = vector.broadcast %14 : vector<1x80xf32> to vector<320x80xf32>
      %16 = arith.mulf %12, %15 : vector<320x80xf32>
      %cst = arith.constant dense<0.000000e+00> : vector<320xf32>
      %17 = vector.multi_reduction <add>, %16, %cst [1] : vector<320x80xf32> to vector<320xf32>
      %18 = vector.shape_cast %17 : vector<320xf32> to vector<320x1xf32>
      %c0_12 = arith.constant 0 : index
      %c0_13 = arith.constant 0 : index
      %19 = vector.load %arg4[%c0_12, %c0_13] : memref<320x1xf32, #tpu.memory_space<vmem>>, vector<320x1xf32>
      %20 = arith.addf %18, %19 : vector<320x1xf32>
      %21 = arith.negf %20 : vector<320x1xf32>
      %22 = math.exp %21 : vector<320x1xf32>
      %cst_14 = arith.constant 1.000000e+00 : f32
      %23 = vector.broadcast %cst_14 : f32 to vector<320x1xf32>
      %24 = arith.addf %23, %22 : vector<320x1xf32>
      %25 = arith.divf %23, %24 : vector<320x1xf32>
      %c0_15 = arith.constant 0 : index
      %c0_16 = arith.constant 0 : index
      %26 = vector.load %arg7[%c0_15, %c0_16] : memref<320x1xf32, #tpu.memory_space<vmem>>, vector<320x1xf32>
      tpu.vector_store %arg7[%c0_15, %c0_16], %25 {strides = array<i32>} : memref<320x1xf32, #tpu.memory_space<vmem>>, vector<320x1xf32>,
    } else {
    }
    %c80_i32 = arith.constant 80 : i32
    %3 = arith.muli %arg1, %c80_i32 : i32
    %4 = tpu.assume_multiple %3, 8 : i32
    %5 = arith.index_cast %4 : i32 to index
    %c0 = arith.constant 0 : index
    %6 = vector.load %arg7[%5, %c0] : memref<320x1xf32, #tpu.memory_space<vmem>>, vector<80x1xf32>
    %c0_1 = arith.constant 0 : index
    %c0_2 = arith.constant 0 : index
    %c0_3 = arith.constant 0 : index
    %7 = vector.load %arg5[%c0_1, %c0_2, %c0_3] : memref<1x80x196xf32, #tpu.memory_space<vmem>>, vector<1x80x196xf32>
    %8 = vector.shape_cast %6 : vector<80x1xf32> to vector<1x80x1xf32>
    %9 = vector.broadcast %8 : vector<1x80x1xf32> to vector<1x80x196xf32>
    %10 = arith.mulf %7, %9 : vector<1x80x196xf32>
    %c0_4 = arith.constant 0 : index
    %c0_5 = arith.constant 0 : index
    %c0_6 = arith.constant 0 : index
    %11 = vector.load %arg6[%c0_4, %c0_5, %c0_6] : memref<1x80x196xf32, #tpu.memory_space<vmem>>, vector<1x80x196xf32>
    tpu.vector_store %arg6[%c0_4, %c0_5, %c0_6], %10 {strides = array<i32>} : memref<1x80x196xf32, #tpu.memory_space<vmem>>, vector<1x80x196xf32>,
    return
  }
  func.func @transform_0(%arg0: i32, %arg1: i32) -> (i32, i32, i32) {
    %c0_i32 = arith.constant 0 : i32
    %c0_i32_0 = arith.constant 0 : i32
    %c0_i32_1 = arith.constant 0 : i32
    return %arg0, %c0_i32, %c0_i32_0 : i32, i32, i32
  }
  func.func @transform_1(%arg0: i32, %arg1: i32) -> (i32, i32) {
    %c0_i32 = arith.constant 0 : i32
    %c0_i32_0 = arith.constant 0 : i32
    %c0_i32_1 = arith.constant 0 : i32
    return %c0_i32, %c0_i32_0 : i32, i32
  }
  func.func @transform_2(%arg0: i32, %arg1: i32) -> (i32, i32) {
    %c0_i32 = arith.constant 0 : i32
    %c0_i32_0 = arith.constant 0 : i32
    %c0_i32_1 = arith.constant 0 : i32
    return %c0_i32, %c0_i32_0 : i32, i32
  }
  func.func @transform_3(%arg0: i32, %arg1: i32) -> (i32, i32, i32) {
    %c0_i32 = arith.constant 0 : i32
    %c0_i32_0 = arith.constant 0 : i32
    return %arg0, %arg1, %c0_i32 : i32, i32, i32
  }
  func.func @transform_4(%arg0: i32, %arg1: i32) -> (i32, i32, i32) {
    %c0_i32 = arith.constant 0 : i32
    %c0_i32_0 = arith.constant 0 : i32
    return %arg0, %arg1, %c0_i32 : i32, i32, i32
  }
}

</mosaic_0001>

<bundles_post_ra>
// kernel: tpu_custom_call.1
= control target key start
LH: loop header
LB: loop body
LE: loop exit
PB: predicated region body
PF: predicated region fallthrough
CT: control target
= control target key end

     0   :  { %s1355_s15 = smov 0   ;;  %s1357_s16 = smov 0   ;;  %s1836_s0 = inlined_call_operand.vmem [shape: f32[1,1,80], index: 0, kind: input, shape index: {}]   ;;  %s1837_s1 = inlined_call_operand.vmem [shape: f32[320,80], index: 1, kind: input, shape index: {}]   ;;  %s1838_s2 = inlined_call_operand.vmem [shape: f32[320,1], index: 2, kind: input, shape index: {}]   ;;  %s1839_s3 = inlined_call_operand.vmem [shape: f32[1,320,196], index: 3, kind: input, shape index: {}]   ;;  %s1840_s4 = inlined_call_operand.vmem [shape: f32[1,320,196], index: 4, kind: output, shape index: {}]  }
   0x1   :  { %s1359_s17 = smov 0  }
   0x2 LB: > { %s23_s18 = sadd.s32 1, %s1323_s16  ;;  %p1067_p0 = scmp.ge.s32.totalorder %s1327_s17, 1  ;;  %s1327_s17 = sphi %s1359_s17, %s14_s17   ;;  %s1323_s16 = sphi %s1357_s16, %s1842_s16   ;;  %s1319_s15 = sphi %s1355_s15, %s1841_s15  }
   0x3   : > { %p24_p1 = scmp.ge.s32.totalorder %s23_s18, 4  ;;  %p192_p2 = scmp.lt.s32.totalorder %s1327_s17, 5 }
   0x5   : > { %s1844_s18 = smov (%p24_p1, %s23_s18), 0  ;;  %p193_p3 = pnand %p1067_p0, %p192_p2 }
   0x6   : > { %s234_s19 = smul.u32 (!%p193_p3), 10, %s1319_s15  ;;  %p1072_p5 = scmp.ne.s32.totalorder (!%p193_p3), %s1319_s15, 0 }
   0x7   : > { %196 = sbr.rel (%p193_p3) target bundleno = 423 (0x1a7), region = 36 }
   0x8   : > { %p237_p4 = scmp.lt.s32.totalorder (!%p193_p3), %s234_s19, 39 }
   0xe   : > { %s1846_s19 = smov (!%p237_p4, %s234_s19), 39  ;;  %259 = sbr.rel (%p1072_p5) target bundleno = 268 (0x10c), region = 40 }
   0xf   : > { %s1116_s20 = sshll.u32 %s1846_s19, 4  ;;  %v262_v0 = vld [vmem:[%s1837_s1 + $0x10] sm:$0xff] (!%p1072_p5)  ;;  %v1393_v1 = vld [vmem:[%s1836_s0] ss:$0 sm:$0xff] (!%p1072_p5)  ;;  %vm347_vm0 = vcmask (!%p1072_p5), 654336   ;;  %v263_v5 = vld [vmem:[%s1837_s1 + $0x18] sm:$0xff] (!%p1072_p5) }
  0x10   : > { %s1379_s23 = scalar_lea.vmem %s1839_s3, %s1116_s20  ;;  %s1384_s26 = scalar_lea.vmem %s1840_s4, %s1116_s20  ;;  %v260_v2 = vld [vmem:[%s1837_s1] sm:$0xff] (!%p1072_p5)  ;;  %v309_v3 = vmul.f32 (!%p1072_p5), %v1393_v1, %v262_v0  ;;  %v261_v6 = vld [vmem:[%s1837_s1 + $0x8] sm:$0xff] (!%p1072_p5)  ;;  %v310_v7 = vmul.f32 (!%p1072_p5), %v1393_v1, %v263_v5  ;;  %v267_v17 = vld [vmem:[%s1837_s1 + $0x38] sm:$0xff] (!%p1072_p5)  ;;  %vm788_vm1 = vcmask (!%p1072_p5), 7168  }
  0x11   : > { %v307_v4 = vmul.f32 (!%p1072_p5), %v1393_v1, %v260_v2  ;;  %v308_v8 = vmul.f32 (!%p1072_p5), %v1393_v1, %v261_v6  ;;  %v265_v9 = vld [vmem:[%s1837_s1 + $0x28] sm:$0xff] (!%p1072_p5)  ;;  %v264_v10 = vld [vmem:[%s1837_s1 + $0x20] sm:$0xff] (!%p1072_p5)  ;;  %v266_v18 = vld [vmem:[%s1837_s1 + $0x30] sm:$0xff] (!%p1072_p5)  ;;  %v314_v21 = vmul.f32 (!%p1072_p5), %v1393_v1, %v267_v17 }
  0x12   : > { %v354_v11 = vsel (!%p1072_p5), %vm347_vm0, %v309_v3, 0.0  ;;  %v357_v13 = vsel (!%p1072_p5), %vm347_vm0, %v310_v7, 0.0  ;;  %v312_v15 = vmul.f32 (!%p1072_p5), %v1393_v1, %v265_v9  ;;  %v311_v16 = vmul.f32 (!%p1072_p5), %v1393_v1, %v264_v10  ;;  %v269_v23 = vld [vmem:[%s1837_s1 + $0x48] sm:$0xff] (!%p1072_p5)  ;;  %v268_v24 = vld [vmem:[%s1837_s1 + $0x40] sm:$0xff] (!%p1072_p5)  ;;  %v271_v29 = vld [vmem:[%s1837_s1 + $0x58] sm:$0xff] (!%p1072_p5) }
  0x13   : > { %v348_v12 = vsel (!%p1072_p5), %vm347_vm0, %v307_v4, 0.0  ;;  %355 = vadd.xlane.f32.xlu1 (!%p1072_p5), %v354_v11  ;;  %v351_v14 = vsel (!%p1072_p5), %vm347_vm0, %v308_v8, 0.0  ;;  %v313_v22 = vmul.f32 (!%p1072_p5), %v1393_v1, %v266_v18  ;;  %v369_v25 = vsel (!%p1072_p5), %vm347_vm0, %v314_v21, 0.0  ;;  %v270_v30 = vld [vmem:[%s1837_s1 + $0x50] sm:$0xff] (!%p1072_p5)  ;;  %v273_v31 = vld [vmem:[%s1837_s1 + $0x68] sm:$0xff] (!%p1072_p5)  ;;  %v272_v32 = vld [vmem:[%s1837_s1 + $0x60] sm:$0xff] (!%p1072_p5) }
  0x14   : > { %349 = vadd.xlane.f32.xlu0 (!%p1072_p5), %v348_v12  ;;  %v363_v19 = vsel (!%p1072_p5), %vm347_vm0, %v312_v15, 0.0  ;;  %v360_v20 = vsel (!%p1072_p5), %vm347_vm0, %v311_v16, 0.0  ;;  %v316_v27 = vmul.f32 (!%p1072_p5), %v1393_v1, %v269_v23  ;;  %v315_v28 = vmul.f32 (!%p1072_p5), %v1393_v1, %v268_v24  ;;  %v293_v33 = vld [vmem:[%s1837_s1 + $0x108] sm:$0xff] (!%p1072_p5)  ;;  %v292_v34 = vld [vmem:[%s1837_s1 + $0x100] sm:$0xff] (!%p1072_p5)  ;;  %v295_v35 = vld [vmem:[%s1837_s1 + $0x118] sm:$0xff] (!%p1072_p5) }
  0x15   : > { %v366_v26 = vsel %vm347_vm0, %v313_v22, 0.0  ;;  %v294_v36 = vld [vmem:[%s1837_s1 + $0x110] sm:$0xff]  ;;  %v297_v37 = vld [vmem:[%s1837_s1 + $0x128] sm:$0xff]  ;;  %v318_v38 = vmul.f32 %v1393_v1, %v271_v29  ;;  %v317_v39 = vmul.f32 %v1393_v1, %v270_v30  ;;  %v320_v40 = vmul.f32 %v1393_v1, %v273_v31  ;;  %v296_v41 = vld [vmem:[%s1837_s1 + $0x120] sm:$0xff] }
  0x16   : > { %v299_v42 = vld [vmem:[%s1837_s1 + $0x138] sm:$0xff]  ;;  %v375_v43 = vsel %vm347_vm0, %v316_v27, 0.0  ;;  %v372_v44 = vsel %vm347_vm0, %v315_v28, 0.0  ;;  %v340_v45 = vmul.f32 %v1393_v1, %v293_v33  ;;  %v339_v46 = vmul.f32 %v1393_v1, %v292_v34  ;;  %v298_v47 = vld [vmem:[%s1837_s1 + $0x130] sm:$0xff]  ;;  %v277_v8 = vld [vmem:[%s1837_s1 + $0x88] sm:$0xff] }
  0x17   : > { %358 = vadd.xlane.f32.xlu1 %v357_v13  ;;  %v319_v48 = vmul.f32 %v1393_v1, %v272_v32  ;;  %v342_v49 = vmul.f32 %v1393_v1, %v295_v35  ;;  %v341_v50 = vmul.f32 %v1393_v1, %v294_v36  ;;  %v344_v51 = vmul.f32 %v1393_v1, %v297_v37  ;;  %v275_v0 = vld [vmem:[%s1837_s1 + $0x78] sm:$0xff]  ;;  %v274_v2 = vld [vmem:[%s1837_s1 + $0x70] sm:$0xff]  ;;  %v276_v9 = vld [vmem:[%s1837_s1 + $0x80] sm:$0xff] }
  0x18   : > { %352 = vadd.xlane.f32.xlu0 %v351_v14  ;;  %v1488_v52 = vsel %vm347_vm0, %v340_v45, 0.0  ;;  %v1491_v53 = vsel %vm347_vm0, %v339_v46, 0.0  ;;  %v343_v54 = vmul.f32 %v1393_v1, %v296_v41  ;;  %v346_v55 = vmul.f32 %v1393_v1, %v299_v42  ;;  %v279_v14 = vld [vmem:[%s1837_s1 + $0x98] sm:$0xff]  ;;  %v278_v15 = vld [vmem:[%s1837_s1 + $0x90] sm:$0xff]  ;;  %v280_v21 = vld [vmem:[%s1837_s1 + $0xa0] sm:$0xff] }
  0x19   : > { %v1496_v56 = vsel %vm347_vm0, %v342_v49, 0.0  ;;  %v1499_v57 = vsel %vm347_vm0, %v341_v50, 0.0  ;;  %v1502_v58 = vsel %vm347_vm0, %v344_v51, 0.0  ;;  %v345_v59 = vmul.f32 %v1393_v1, %v298_v47  ;;  %v282_v27 = vld [vmem:[%s1837_s1 + $0xb0] sm:$0xff]  ;;  %v285_v32 = vld [vmem:[%s1837_s1 + $0xc8] sm:$0xff]  ;;  %v284_v33 = vld [vmem:[%s1837_s1 + $0xc0] sm:$0xff] }
  0x1a   : > { %v381_v60 = vsel %vm347_vm0, %v318_v38, 0.0  ;;  %v378_v61 = vsel %vm347_vm0, %v317_v39, 0.0  ;;  %v1508_v62 = vsel %vm347_vm0, %v343_v54, 0.0  ;;  %v1511_v63 = vsel %vm347_vm0, %v346_v55, 0.0  ;;  %v287_v38 = vld [vmem:[%s1837_s1 + $0xd8] sm:$0xff]  ;;  %v286_v39 = vld [vmem:[%s1837_s1 + $0xd0] sm:$0xff] }
  0x1b   : > { %364 = vadd.xlane.f32.xlu1 %v363_v19  ;;  %v1520_v3 = vsel %vm347_vm0, %v345_v59, 0.0  ;;  %v387_v4 = vsel %vm347_vm0, %v320_v40, 0.0  ;;  %v384_v5 = vsel %vm347_vm0, %v319_v48, 0.0  ;;  %v322_v6 = vmul.f32 %v1393_v1, %v275_v0  ;;  %v288_v45 = vld [vmem:[%s1837_s1 + $0xe0] sm:$0xff]  ;;  %v291_v50 = vld [vmem:[%s1837_s1 + $0xf8] sm:$0xff]  ;;  %v290_v51 = vld [vmem:[%s1837_s1 + $0xf0] sm:$0xff] }
  0x1c   : > { %361 = vadd.xlane.f32.xlu0 %v360_v20  ;;  %v321_v7 = vmul.f32 %v1393_v1, %v274_v2  ;;  %v324_v12 = vmul.f32 %v1393_v1, %v277_v8  ;;  %v323_v13 = vmul.f32 %v1393_v1, %v276_v9  ;;  %v326_v18 = vmul.f32 %v1393_v1, %v279_v14  ;;  %v281_v20 = vld [vmem:[%s1837_s1 + $0xa8] sm:$0xff]  ;;  %v472_v9 = vld [vmem:[%s1838_s2 + $0x20] sm:$0xff] }
  0x1d   : > { %v393_v10 = vsel %vm347_vm0, %v322_v6, 0.0  ;;  %v325_v19 = vmul.f32 %v1393_v1, %v278_v15  ;;  %v328_v24 = vmul.f32 %v1393_v1, %v281_v20  ;;  %v329_v31 = vmul.f32 %v1393_v1, %v282_v27  ;;  %v473_v8 = vld [vmem:[%s1838_s2 + $0x28] sm:$0xff] }
  0x1e   : > { %v390_v11 = vsel %vm347_vm0, %v321_v7, 0.0  ;;  %v399_v16 = vsel %vm347_vm0, %v324_v12, 0.0  ;;  %v396_v17 = vsel %vm347_vm0, %v323_v13, 0.0  ;;  %v405_v22 = vsel %vm347_vm0, %v326_v18, 0.0 }
  0x1f   : > { %370 = vadd.xlane.f32.xlu1 %v369_v25  ;;  %v402_v23 = vsel %vm347_vm0, %v325_v19, 0.0  ;;  %v327_v25 = vmul.f32 %v1393_v1, %v280_v21  ;;  %v411_v28 = vsel %vm347_vm0, %v328_v24, 0.0  ;;  %v414_v35 = vsel %vm347_vm0, %v329_v31, 0.0  ;;  %v477_v24 = vld [vmem:[%s1838_s2 + $0x48] sm:$0xff] }
  0x20   : > { %367 = vadd.xlane.f32.xlu0 %v366_v26  ;;  %v283_v26 = vld [vmem:[%s1837_s1 + $0xb8] sm:$0xff]  ;;  %v332_v36 = vmul.f32 %v1393_v1, %v285_v32  ;;  %v331_v37 = vmul.f32 %v1393_v1, %v284_v33  ;;  %v334_v42 = vmul.f32 %v1393_v1, %v287_v38  ;;  %v335_v49 = vmul.f32 %v1393_v1, %v288_v45 }
  0x21   : > { %v408_v29 = vsel %vm347_vm0, %v327_v25, 0.0  ;;  %v330_v30 = vmul.f32 %v1393_v1, %v283_v26  ;;  %v338_v59 = vmul.f32 %v1393_v1, %v291_v50  ;;  %v476_v25 = vld [vmem:[%s1838_s2 + $0x40] sm:$0xff] }
  0x22   : > { %v423_v40 = vsel %vm347_vm0, %v332_v36, 0.0  ;;  %v420_v41 = vsel %vm347_vm0, %v331_v37, 0.0  ;;  %v429_v46 = vsel %vm347_vm0, %v334_v42, 0.0  ;;  %v432_v55 = vsel %vm347_vm0, %v335_v49, 0.0  ;;  %v479_v36 = vld [vmem:[%s1838_s2 + $0x58] sm:$0xff]  ;;  %v478_v37 = vld [vmem:[%s1838_s2 + $0x50] sm:$0xff] }
  0x23   : > { %376 = vadd.xlane.f32.xlu1 %v375_v43  ;;  %v417_v34 = vsel %vm347_vm0, %v330_v30, 0.0  ;;  %v333_v43 = vmul.f32 %v1393_v1, %v286_v39  ;;  %v480_v49 = vld [vmem:[%s1838_s2 + $0x60] sm:$0xff] }
  0x24   : > { %373 = vadd.xlane.f32.xlu0 %v372_v44  ;;  %v289_v44 = vld [vmem:[%s1837_s1 + $0xe8] sm:$0xff] }
  0x25   : > { %v426_v47 = vsel %vm347_vm0, %v333_v43, 0.0  ;;  %v336_v48 = vmul.f32 %v1393_v1, %v289_v44 }
  0x27   : > { %382 = vadd.xlane.f32.xlu1 %v381_v60  ;;  %v435_v54 = vsel %vm347_vm0, %v336_v48, 0.0  ;;  %v337_v60 = vmul.f32 %v1393_v1, %v290_v51  ;;  %v470_v1 = vld [vmem:[%s1838_s2 + $0x10] sm:$0xff]  ;;  %v481_v48 = vld [vmem:[%s1838_s2 + $0x68] sm:$0xff] }
  0x28   : > { %379 = vadd.xlane.f32.xlu0 %v378_v61  ;;  %v441_v61 = vsel %vm347_vm0, %v338_v59, 0.0 }
  0x29   : > { %v438_v0 = vsel %vm347_vm0, %v337_v60, 0.0 }
  0x2b   : > { %388 = vadd.xlane.f32.xlu1 %v387_v4 }
  0x2c   : > { %385 = vadd.xlane.f32.xlu0 %v384_v5 }
  0x2f   : > { %394 = vadd.xlane.f32.xlu1 %v393_v10 }
  0x30   : > { %391 = vadd.xlane.f32.xlu0 %v390_v11 }
  0x33   : > { %400 = vadd.xlane.f32.xlu1 %v399_v16  ;;  %v475_v16 = vld [vmem:[%s1838_s2 + $0x38] sm:$0xff] }
  0x34   : > { %397 = vadd.xlane.f32.xlu0 %v396_v17  ;;  %v474_v17 = vld [vmem:[%s1838_s2 + $0x30] sm:$0xff] }
  0x37   : > { %406 = vadd.xlane.f32.xlu1 %v405_v22 }
  0x38   : > { %403 = vadd.xlane.f32.xlu0 %v402_v23 }
  0x3b   : > { %412 = vadd.xlane.f32.xlu1 %v411_v28 }
  0x3c   : > { %409 = vadd.xlane.f32.xlu0 %v408_v29 }
  0x3f   : > { %418 = vadd.xlane.f32.xlu1 %v417_v34 }
  0x40   : > { %415 = vadd.xlane.f32.xlu0 %v414_v35 }
  0x43   : > { %424 = vadd.xlane.f32.xlu1 %v423_v40 }
  0x44   : > { %421 = vadd.xlane.f32.xlu0 %v420_v41 }
  0x47   : > { %430 = vadd.xlane.f32.xlu1 %v429_v46 }
  0x48   : > { %427 = vadd.xlane.f32.xlu0 %v426_v47 }
  0x4b   : > { %436 = vadd.xlane.f32.xlu1 %v435_v54 }
  0x4c   : > { %433 = vadd.xlane.f32.xlu0 %v432_v55 }
  0x4f   : > { %442 = vadd.xlane.f32.xlu1 %v441_v61 }
  0x50   : > { %439 = vadd.xlane.f32.xlu0 %v438_v0 }
  0x53   : > { %448 = vadd.xlane.f32.xlu1 %v1488_v52  ;;  %v468_v52 = vld [vmem:[%s1838_s2] sm:$0xff] }
  0x54   : > { %445 = vadd.xlane.f32.xlu0 %v1491_v53 }
  0x57   : > { %454 = vadd.xlane.f32.xlu1 %v1496_v56 }
  0x58   : > { %451 = vadd.xlane.f32.xlu0 %v1499_v57 }
  0x5b   : > { %460 = vadd.xlane.f32.xlu1 %v1502_v58  ;;  %v471_v58 = vld [vmem:[%s1838_s2 + $0x18] sm:$0xff] }
  0x5c   : > { %457 = vadd.xlane.f32.xlu0 %v1508_v62  ;;  %v469_v62 = vld [vmem:[%s1838_s2 + $0x8] sm:$0xff] }
  0x5f   : > { %466 = vadd.xlane.f32.xlu1 %v1511_v63 }
  0x60   : > { %463 = vadd.xlane.f32.xlu0 %v1520_v3 }
  0xa0   : > { %v356_v53 = vpop.xlane.xlu1 %355 }
  0xa1   : > { %v350_v56 = vpop.xlane.xlu0 %349  ;;  %v510_v2 = vadd.f32 %v470_v1, %v356_v53  ;;  %v483_v53 = vld [vmem:[%s1838_s2 + $0x78] sm:$0xff] }
  0xa2   : > { %v508_v57 = vadd.f32 %v468_v52, %v350_v56  ;;  %v482_v56 = vld [vmem:[%s1838_s2 + $0x70] sm:$0xff] }
  0xa3   : > { %v1076_v63 = vmul.f32 -1.442695, %v510_v2 }
  0xa4   : > { %v1074_v3 = vmul.f32 -1.442695, %v508_v57  ;;  %v359_v4 = vpop.xlane.xlu1 %358 }
  0xa5   : > { %v353_v5 = vpop.xlane.xlu0 %352  ;;  %1143 = vpow2.f32 %v1076_v63  ;;  %v511_v6 = vadd.f32 %v471_v58, %v359_v4 }
  0xa6   : > { %v509_v7 = vadd.f32 %v469_v62, %v353_v5  ;;  %1145 = vpow2.f32 %v1074_v3 }
  0xa7   : > { %v1077_v10 = vmul.f32 -1.442695, %v511_v6 }
  0xa8   : > { %v1075_v11 = vmul.f32 -1.442695, %v509_v7  ;;  %v365_v12 = vpop.xlane.xlu1 %364 }
  0xa9   : > { %v362_v13 = vpop.xlane.xlu0 %361  ;;  %1147 = vpow2.f32 %v1077_v10  ;;  %v513_v14 = vadd.f32 %v473_v8, %v365_v12  ;;  %v484_v10 = vld [vmem:[%s1838_s2 + $0x80] sm:$0xff] }
  0xaa   : > { %v512_v15 = vadd.f32 %v472_v9, %v362_v13  ;;  %1149 = vpow2.f32 %v1075_v11  ;;  %v485_v9 = vld [vmem:[%s1838_s2 + $0x88] sm:$0xff] }
  0xab   : > { %v1079_v18 = vmul.f32 -1.442695, %v513_v14 }
  0xac   : > { %v1078_v19 = vmul.f32 -1.442695, %v512_v15  ;;  %v371_v20 = vpop.xlane.xlu1 %370 }
  0xad   : > { %v368_v21 = vpop.xlane.xlu0 %367  ;;  %1151 = vpow2.f32 %v1079_v18  ;;  %v515_v22 = vadd.f32 %v475_v16, %v371_v20 }
  0xae   : > { %v514_v23 = vadd.f32 %v474_v17, %v368_v21  ;;  %1153 = vpow2.f32 %v1078_v19 }
  0xaf   : > { %v1144_v26 = vpop.eup %1143  ;;  %v1081_v27 = vmul.f32 -1.442695, %v515_v22 }
  0xb0   : > { %v1146_v28 = vpop.eup %1145  ;;  %v670_v29 = vadd.f32 1.0, %v1144_v26  ;;  %v1080_v30 = vmul.f32 -1.442695, %v514_v23  ;;  %v377_v31 = vpop.xlane.xlu1 %376  ;;  %v487_v23 = vld [vmem:[%s1838_s2 + $0x98] sm:$0xff] }
  0xb1   : > { %v374_v32 = vpop.xlane.xlu0 %373  ;;  %v668_v33 = vadd.f32 1.0, %v1146_v28  ;;  %1155 = vpow2.f32 %v1081_v27  ;;  %v517_v34 = vadd.f32 %v477_v24, %v377_v31  ;;  %v486_v24 = vld [vmem:[%s1838_s2 + $0x90] sm:$0xff] }
  0xb2   : > { %v516_v35 = vadd.f32 %v476_v25, %v374_v32  ;;  %1157 = vrcp.f32 %v670_v29 }
  0xb3   : > { %v1148_v38 = vpop.eup %1147  ;;  %1159 = vrcp.f32 %v668_v33  ;;  %v1083_v39 = vmul.f32 -1.442695, %v517_v34 }
  0xb4   : > { %v1150_v40 = vpop.eup %1149  ;;  %v671_v41 = vadd.f32 1.0, %v1148_v38  ;;  %1161 = vpow2.f32 %v1080_v30  ;;  %v1082_v42 = vmul.f32 -1.442695, %v516_v35  ;;  %v383_v43 = vpop.xlane.xlu1 %382  ;;  %v488_v38 = vld [vmem:[%s1838_s2 + $0xa0] sm:$0xff] }
  0xb5   : > { %v380_v44 = vpop.xlane.xlu0 %379  ;;  %v669_v45 = vadd.f32 1.0, %v1150_v40  ;;  %1163 = vpow2.f32 %v1083_v39  ;;  %v519_v46 = vadd.f32 %v479_v36, %v383_v43 }
  0xb6   : > { %v518_v47 = vadd.f32 %v478_v37, %v380_v44  ;;  %1165 = vrcp.f32 %v671_v41  ;;  %v489_v37 = vld [vmem:[%s1838_s2 + $0xa8] sm:$0xff] }
  0xb7   : > { %v1152_v50 = vpop.eup %1151  ;;  %1167 = vrcp.f32 %v669_v45  ;;  %v1085_v51 = vmul.f32 -1.442695, %v519_v46 }
  0xb8   : > { %v1154_v54 = vpop.eup %1153  ;;  %v673_v55 = vadd.f32 1.0, %v1152_v50  ;;  %1169 = vpow2.f32 %v1082_v42  ;;  %v1084_v59 = vmul.f32 -1.442695, %v518_v47  ;;  %v389_v60 = vpop.xlane.xlu1 %388 }
  0xb9   : > { %v386_v61 = vpop.xlane.xlu0 %385  ;;  %v672_v0 = vadd.f32 1.0, %v1154_v54  ;;  %1171 = vpow2.f32 %v1085_v51  ;;  %v521_v1 = vadd.f32 %v481_v48, %v389_v60  ;;  %v491_v51 = vld [vmem:[%s1838_s2 + $0xb8] sm:$0xff]  ;;  %v490_v54 = vld [vmem:[%s1838_s2 + $0xb0] sm:$0xff] }
  0xba   : > { %v520_v52 = vadd.f32 %v480_v49, %v386_v61  ;;  %1173 = vrcp.f32 %v673_v55 }
  0xbb   : > { %v1156_v2 = vpop.eup %1155  ;;  %1175 = vrcp.f32 %v672_v0  ;;  %v1087_v57 = vmul.f32 -1.442695, %v521_v1 }
  0xbc   : > { %v1086_v58 = vmul.f32 -1.442695, %v520_v52  ;;  %v1158_v62 = vpop.eup %1157  ;;  %v675_v63 = vadd.f32 1.0, %v1156_v2  ;;  %1177 = vpow2.f32 %v1084_v59  ;;  %v395_v3 = vpop.xlane.xlu1 %394 }
  0xbd   : > { %v392_v4 = vpop.xlane.xlu0 %391  ;;  %v1160_v5 = vpop.eup %1159  ;;  %791 = vst.msk [vmem:[#allocation2 + $0x10] sm:$0xff] %vm788_vm1, %v1158_v62  ;;  %1179 = vpow2.f32 %v1087_v57  ;;  %v523_v6 = vadd.f32 %v483_v53, %v395_v3  ;;  %v492_v62 = vld [vmem:[%s1838_s2 + $0xc0] sm:$0xff] }
  0xbe   : > { %v522_v7 = vadd.f32 %v482_v56, %v392_v4  ;;  %v1162_v8 = vpop.eup %1161  ;;  %789 = vst.msk [vmem:[#allocation2] sm:$0xff] %vm788_vm1, %v1160_v5  ;;  %1181 = vrcp.f32 %v675_v63 }
  0xbf   : > { %v1164_v11 = vpop.eup %1163  ;;  %v674_v12 = vadd.f32 1.0, %v1162_v8  ;;  %1183 = vpow2.f32 %v1086_v58  ;;  %v1089_v13 = vmul.f32 -1.442695, %v523_v6  ;;  %v493_v58 = vld [vmem:[%s1838_s2 + $0xc8] sm:$0xff] }
  0xc0   : > { %v1166_v14 = vpop.eup %1165  ;;  %v677_v15 = vadd.f32 1.0, %v1164_v11  ;;  %v1088_v16 = vmul.f32 -1.442695, %v522_v7  ;;  %v401_v17 = vpop.xlane.xlu1 %400 }
  0xc1   : > { %v398_v18 = vpop.xlane.xlu0 %397  ;;  %v1168_v19 = vpop.eup %1167  ;;  %792 = vst.msk [vmem:[#allocation2 + $0x18] sm:$0xff] %vm788_vm1, %v1166_v14  ;;  %1185 = vrcp.f32 %v674_v12  ;;  %v525_v20 = vadd.f32 %v485_v9, %v401_v17  ;;  %v495_v14 = vld [vmem:[%s1838_s2 + $0xd8] sm:$0xff] }
  0xc2   : > { %v524_v21 = vadd.f32 %v484_v10, %v398_v18  ;;  %v1170_v22 = vpop.eup %1169  ;;  %790 = vst.msk [vmem:[#allocation2 + $0x8] sm:$0xff] %vm788_vm1, %v1168_v19  ;;  %1187 = vrcp.f32 %v677_v15  ;;  %v494_v15 = vld [vmem:[%s1838_s2 + $0xd0] sm:$0xff] }
  0xc3   : > { %v1172_v25 = vpop.eup %1171  ;;  %v676_v26 = vadd.f32 1.0, %v1170_v22  ;;  %1189 = vpow2.f32 %v1089_v13  ;;  %v1091_v27 = vmul.f32 -1.442695, %v525_v20 }
  0xc4   : > { %v1174_v28 = vpop.eup %1173  ;;  %v679_v29 = vadd.f32 1.0, %v1172_v25  ;;  %1191 = vpow2.f32 %v1088_v16  ;;  %v1090_v30 = vmul.f32 -1.442695, %v524_v21  ;;  %v407_v31 = vpop.xlane.xlu1 %406 }
  0xc5   : > { %v404_v32 = vpop.xlane.xlu0 %403  ;;  %v1176_v33 = vpop.eup %1175  ;;  %794 = vst.msk [vmem:[#allocation2 + $0x28] sm:$0xff] %vm788_vm1, %v1174_v28  ;;  %1193 = vrcp.f32 %v676_v26  ;;  %v527_v34 = vadd.f32 %v487_v23, %v407_v31  ;;  %v497_v28 = vld [vmem:[%s1838_s2 + $0xe8] sm:$0xff] }
  0xc6   : > { %v526_v35 = vadd.f32 %v486_v24, %v404_v32  ;;  %v1178_v36 = vpop.eup %1177  ;;  %793 = vst.msk [vmem:[#allocation2 + $0x20] sm:$0xff] %vm788_vm1, %v1176_v33  ;;  %1195 = vrcp.f32 %v679_v29  ;;  %v496_v29 = vld [vmem:[%s1838_s2 + $0xe0] sm:$0xff] }
  0xc7   : > { %v1180_v39 = vpop.eup %1179  ;;  %v678_v40 = vadd.f32 1.0, %v1178_v36  ;;  %1197 = vpow2.f32 %v1091_v27  ;;  %v1093_v41 = vmul.f32 -1.442695, %v527_v34 }
  0xc8   : > { %v1182_v42 = vpop.eup %1181  ;;  %v681_v43 = vadd.f32 1.0, %v1180_v39  ;;  %1199 = vpow2.f32 %v1090_v30  ;;  %v413_v44 = vpop.xlane.xlu1 %412  ;;  %v1092_v47 = vmul.f32 -1.442695, %v526_v35 }
  0xc9   : > { %v410_v45 = vpop.xlane.xlu0 %409  ;;  %v1184_v46 = vpop.eup %1183  ;;  %796 = vst.msk [vmem:[#allocation2 + $0x38] sm:$0xff] %vm788_vm1, %v1182_v42  ;;  %1201 = vrcp.f32 %v678_v40  ;;  %v529_v48 = vadd.f32 %v489_v37, %v413_v44  ;;  %v498_v44 = vld [vmem:[%s1838_s2 + $0xf0] sm:$0xff] }
  0xca   : > { %v528_v49 = vadd.f32 %v488_v38, %v410_v45  ;;  %1203 = vrcp.f32 %v681_v43  ;;  %v680_v50 = vadd.f32 1.0, %v1184_v46  ;;  %v499_v43 = vld [vmem:[%s1838_s2 + $0xf8] sm:$0xff] }
  0xcb   : > { %v1186_v55 = vpop.eup %1185  ;;  %1205 = vpow2.f32 %v1093_v41  ;;  %v1095_v59 = vmul.f32 -1.442695, %v529_v48 }
  0xcc   : > { %v1094_v60 = vmul.f32 -1.442695, %v528_v49  ;;  %v1188_v61 = vpop.eup %1187  ;;  %795 = vst.msk [vmem:[#allocation2 + $0x30] sm:$0xff] %vm788_vm1, %v1186_v55  ;;  %1207 = vrcp.f32 %v680_v50  ;;  %v419_v0 = vpop.xlane.xlu1 %418 }
  0xcd   : > { %v416_v1 = vpop.xlane.xlu0 %415  ;;  %v1190_v52 = vpop.eup %1189  ;;  %798 = vst.msk [vmem:[#allocation2 + $0x48] sm:$0xff] %vm788_vm1, %v1188_v61  ;;  %1209 = vpow2.f32 %v1092_v47  ;;  %v531_v53 = vadd.f32 %v491_v51, %v419_v0  ;;  %v501_v0 = vld [vmem:[%s1838_s2 + $0x108] sm:$0xff] }
  0xce   : > { %v530_v56 = vadd.f32 %v490_v54, %v416_v1  ;;  %v1192_v2 = vpop.eup %1191  ;;  %v683_v57 = vadd.f32 1.0, %v1190_v52  ;;  %1211 = vpow2.f32 %v1095_v59  ;;  %v500_v1 = vld [vmem:[%s1838_s2 + $0x100] sm:$0xff] }
  0xcf   : > { %v1194_v63 = vpop.eup %1193  ;;  %v682_v3 = vadd.f32 1.0, %v1192_v2  ;;  %1213 = vpow2.f32 %v1094_v60  ;;  %v1097_v4 = vmul.f32 -1.442695, %v531_v53 }
  0xd0   : > { %v1096_v5 = vmul.f32 -1.442695, %v530_v56  ;;  %v1196_v6 = vpop.eup %1195  ;;  %797 = vst.msk [vmem:[#allocation2 + $0x40] sm:$0xff] %vm788_vm1, %v1194_v63  ;;  %1215 = vrcp.f32 %v683_v57  ;;  %v425_v7 = vpop.xlane.xlu1 %424 }
  0xd1   : > { %v422_v8 = vpop.xlane.xlu0 %421  ;;  %v1198_v9 = vpop.eup %1197  ;;  %800 = vst.msk [vmem:[#allocation2 + $0x58] sm:$0xff] %vm788_vm1, %v1196_v6  ;;  %1217 = vrcp.f32 %v682_v3  ;;  %v533_v10 = vadd.f32 %v493_v58, %v425_v7  ;;  %v503_v7 = vld [vmem:[%s1838_s2 + $0x118] sm:$0xff] }
  0xd2   : > { %v532_v11 = vadd.f32 %v492_v62, %v422_v8  ;;  %v1200_v12 = vpop.eup %1199  ;;  %v685_v13 = vadd.f32 1.0, %v1198_v9  ;;  %1219 = vpow2.f32 %v1097_v4  ;;  %v502_v8 = vld [vmem:[%s1838_s2 + $0x110] sm:$0xff] }
  0xd3   : > { %v1202_v16 = vpop.eup %1201  ;;  %v684_v17 = vadd.f32 1.0, %v1200_v12  ;;  %1221 = vpow2.f32 %v1096_v5  ;;  %v1099_v18 = vmul.f32 -1.442695, %v533_v10 }
  0xd4   : > { %v1098_v19 = vmul.f32 -1.442695, %v532_v11  ;;  %v1204_v20 = vpop.eup %1203  ;;  %799 = vst.msk [vmem:[#allocation2 + $0x50] sm:$0xff] %vm788_vm1, %v1202_v16  ;;  %1223 = vrcp.f32 %v685_v13  ;;  %v431_v21 = vpop.xlane.xlu1 %430 }
  0xd5   : > { %v428_v22 = vpop.xlane.xlu0 %427  ;;  %v1206_v23 = vpop.eup %1205  ;;  %802 = vst.msk [vmem:[#allocation2 + $0x68] sm:$0xff] %vm788_vm1, %v1204_v20  ;;  %1225 = vrcp.f32 %v684_v17  ;;  %v535_v24 = vadd.f32 %v495_v14, %v431_v21  ;;  %v505_v20 = vld [vmem:[%s1838_s2 + $0x128] sm:$0xff]  ;;  %v504_v21 = vld [vmem:[%s1838_s2 + $0x120] sm:$0xff] }
  0xd6   : > { %v534_v25 = vadd.f32 %v494_v15, %v428_v22  ;;  %v1208_v26 = vpop.eup %1207  ;;  %v687_v27 = vadd.f32 1.0, %v1206_v23  ;;  %1227 = vpow2.f32 %v1099_v18 }
  0xd7   : > { %v1210_v30 = vpop.eup %1209  ;;  %801 = vst.msk [vmem:[#allocation2 + $0x60] sm:$0xff] %vm788_vm1, %v1208_v26  ;;  %1229 = vpow2.f32 %v1098_v19  ;;  %v1101_v31 = vmul.f32 -1.442695, %v535_v24 }
  0xd8   : > { %v1212_v32 = vpop.eup %1211  ;;  %1231 = vrcp.f32 %v687_v27  ;;  %v686_v33 = vadd.f32 1.0, %v1210_v30  ;;  %v1100_v34 = vmul.f32 -1.442695, %v534_v25  ;;  %v437_v35 = vpop.xlane.xlu1 %436 }
  0xd9   : > { %v434_v36 = vpop.xlane.xlu0 %433  ;;  %v1214_v37 = vpop.eup %1213  ;;  %v689_v38 = vadd.f32 1.0, %v1212_v32  ;;  %1233 = vpow2.f32 %v1101_v31  ;;  %v537_v39 = vadd.f32 %v497_v28, %v437_v35  ;;  %v506_v35 = vld [vmem:[%s1838_s2 + $0x130] sm:$0xff] }
  0xda   : > { %v536_v40 = vadd.f32 %v496_v29, %v434_v36  ;;  %v1216_v41 = vpop.eup %1215  ;;  %1235 = vrcp.f32 %v686_v33  ;;  %v688_v42 = vadd.f32 1.0, %v1214_v37 }
  0xdb   : > { %v1218_v45 = vpop.eup %1217  ;;  %804 = vst.msk [vmem:[#allocation2 + $0x78] sm:$0xff] %vm788_vm1, %v1216_v41  ;;  %1237 = vrcp.f32 %v689_v38  ;;  %v1103_v46 = vmul.f32 -1.442695, %v537_v39 }
  0xdc   : > { %v1220_v47 = vpop.eup %1219  ;;  %803 = vst.msk [vmem:[#allocation2 + $0x70] sm:$0xff] %vm788_vm1, %v1218_v45  ;;  %1239 = vrcp.f32 %v688_v42  ;;  %v1102_v48 = vmul.f32 -1.442695, %v536_v40  ;;  %v443_v49 = vpop.xlane.xlu1 %442 }
  0xdd   : > { %v440_v50 = vpop.xlane.xlu0 %439  ;;  %v1222_v51 = vpop.eup %1221  ;;  %v691_v54 = vadd.f32 1.0, %v1220_v47  ;;  %1241 = vpow2.f32 %v1100_v34  ;;  %v539_v55 = vadd.f32 %v499_v43, %v443_v49  ;;  %v507_v34 = vld [vmem:[%s1838_s2 + $0x138] sm:$0xff] }
  0xde   : > { %v538_v59 = vadd.f32 %v498_v44, %v440_v50  ;;  %v1224_v60 = vpop.eup %1223  ;;  %v690_v61 = vadd.f32 1.0, %v1222_v51  ;;  %1243 = vpow2.f32 %v1103_v46 }
  0xdf   : > { %v1226_v52 = vpop.eup %1225  ;;  %806 = vst.msk [vmem:[#allocation2 + $0x88] sm:$0xff] %vm788_vm1, %v1224_v60  ;;  %1245 = vrcp.f32 %v691_v54  ;;  %v1105_v53 = vmul.f32 -1.442695, %v539_v55 }
  0xe0   : > { %v1228_v56 = vpop.eup %1227  ;;  %805 = vst.msk [vmem:[#allocation2 + $0x80] sm:$0xff] %vm788_vm1, %v1226_v52  ;;  %1247 = vrcp.f32 %v690_v61  ;;  %v1104_v2 = vmul.f32 -1.442695, %v538_v59  ;;  %v449_v57 = vpop.xlane.xlu1 %448 }
  0xe1   : > { %v446_v58 = vpop.xlane.xlu0 %445  ;;  %v1230_v62 = vpop.eup %1229  ;;  %v693_v63 = vadd.f32 1.0, %v1228_v56  ;;  %1249 = vpow2.f32 %v1102_v48  ;;  %v541_v3 = vadd.f32 %v501_v0, %v449_v57 }
  0xe2   : > { %v540_v4 = vadd.f32 %v500_v1, %v446_v58  ;;  %v1232_v5 = vpop.eup %1231  ;;  %v692_v6 = vadd.f32 1.0, %v1230_v62  ;;  %1251 = vpow2.f32 %v1105_v53 }
  0xe3   : > { %v1234_v9 = vpop.eup %1233  ;;  %808 = vst.msk [vmem:[#allocation2 + $0x98] sm:$0xff] %vm788_vm1, %v1232_v5  ;;  %1253 = vrcp.f32 %v693_v63  ;;  %v1107_v10 = vmul.f32 -1.442695, %v541_v3 }
  0xe4   : > { %v1236_v11 = vpop.eup %1235  ;;  %1255 = vrcp.f32 %v692_v6  ;;  %v695_v12 = vadd.f32 1.0, %v1234_v9  ;;  %v1106_v13 = vmul.f32 -1.442695, %v540_v4  ;;  %v455_v14 = vpop.xlane.xlu1 %454 }
  0xe5   : > { %v452_v15 = vpop.xlane.xlu0 %451  ;;  %v1238_v16 = vpop.eup %1237  ;;  %807 = vst.msk [vmem:[#allocation2 + $0x90] sm:$0xff] %vm788_vm1, %v1236_v11  ;;  %1257 = vpow2.f32 %v1104_v2  ;;  %v543_v17 = vadd.f32 %v503_v7, %v455_v14 }
  0xe6   : > { %v542_v18 = vadd.f32 %v502_v8, %v452_v15  ;;  %v1240_v19 = vpop.eup %1239  ;;  %810 = vst.msk [vmem:[#allocation2 + $0xa8] sm:$0xff] %vm788_vm1, %v1238_v16  ;;  %1259 = vrcp.f32 %v695_v12 }
  0xe7   : > { %v1242_v22 = vpop.eup %1241  ;;  %809 = vst.msk [vmem:[#allocation2 + $0xa0] sm:$0xff] %vm788_vm1, %v1240_v19  ;;  %1261 = vpow2.f32 %v1107_v10  ;;  %v1109_v23 = vmul.f32 -1.442695, %v543_v17 }
  0xe8   : > { %v1244_v24 = vpop.eup %1243  ;;  %v694_v25 = vadd.f32 1.0, %v1242_v22  ;;  %1263 = vpow2.f32 %v1106_v13  ;;  %v1108_v26 = vmul.f32 -1.442695, %v542_v18  ;;  %v461_v27 = vpop.xlane.xlu1 %460 }
  0xe9   : > { %v458_v28 = vpop.xlane.xlu0 %457  ;;  %v1246_v29 = vpop.eup %1245  ;;  %v697_v30 = vadd.f32 1.0, %v1244_v24  ;;  %1265 = vpow2.f32 %v1109_v23  ;;  %v545_v31 = vadd.f32 %v505_v20, %v461_v27 }
  0xea   : > { %v544_v32 = vadd.f32 %v504_v21, %v458_v28  ;;  %v1248_v33 = vpop.eup %1247  ;;  %812 = vst.msk [vmem:[#allocation2 + $0xb8] sm:$0xff] %vm788_vm1, %v1246_v29  ;;  %1267 = vrcp.f32 %v694_v25 }
  0xeb   : > { %v1250_v36 = vpop.eup %1249  ;;  %811 = vst.msk [vmem:[#allocation2 + $0xb0] sm:$0xff] %vm788_vm1, %v1248_v33  ;;  %1269 = vrcp.f32 %v697_v30  ;;  %v1111_v37 = vmul.f32 -1.442695, %v545_v31 }
  0xec   : > { %v1252_v38 = vpop.eup %1251  ;;  %v696_v39 = vadd.f32 1.0, %v1250_v36  ;;  %1271 = vpow2.f32 %v1108_v26  ;;  %v1110_v40 = vmul.f32 -1.442695, %v544_v32  ;;  %v467_v41 = vpop.xlane.xlu1 %466 }
  0xed   : > { %v464_v42 = vpop.xlane.xlu0 %463  ;;  %v1254_v43 = vpop.eup %1253  ;;  %v699_v44 = vadd.f32 1.0, %v1252_v38  ;;  %1273 = vpow2.f32 %v1111_v37  ;;  %v547_v45 = vadd.f32 %v507_v34, %v467_v41 }
  0xee   : > { %v546_v46 = vadd.f32 %v506_v35, %v464_v42  ;;  %v1256_v47 = vpop.eup %1255  ;;  %814 = vst.msk [vmem:[#allocation2 + $0xc8] sm:$0xff] %vm788_vm1, %v1254_v43  ;;  %1275 = vrcp.f32 %v696_v39 }
  0xef   : > { %v1258_v48 = vpop.eup %1257  ;;  %813 = vst.msk [vmem:[#allocation2 + $0xc0] sm:$0xff] %vm788_vm1, %v1256_v47  ;;  %1277 = vrcp.f32 %v699_v44  ;;  %v1113_v49 = vmul.f32 -1.442695, %v547_v45 }
  0xf0   : > { %v1112_v50 = vmul.f32 -1.442695, %v546_v46  ;;  %v1260_v51 = vpop.eup %1259  ;;  %v698_v54 = vadd.f32 1.0, %v1258_v48  ;;  %1279 = vpow2.f32 %v1110_v40 }
  0xf1   : > { %v1262_v55 = vpop.eup %1261  ;;  %816 = vst.msk [vmem:[#allocation2 + $0xd8] sm:$0xff] %vm788_vm1, %v1260_v51  ;;  %1281 = vpow2.f32 %v1113_v49 }
  0xf2   : > { %v1264_v59 = vpop.eup %1263  ;;  %1283 = vrcp.f32 %v698_v54  ;;  %v701_v60 = vadd.f32 1.0, %v1262_v55 }
  0xf3   : > { %v1266_v61 = vpop.eup %1265  ;;  %v700_v0 = vadd.f32 1.0, %v1264_v59  ;;  %1285 = vpow2.f32 %v1112_v50 }
  0xf4   : > { %v1268_v1 = vpop.eup %1267  ;;  %1287 = vrcp.f32 %v701_v60  ;;  %v703_v52 = vadd.f32 1.0, %v1266_v61 }
  0xf5   : > { %v1270_v53 = vpop.eup %1269  ;;  %815 = vst.msk [vmem:[#allocation2 + $0xd0] sm:$0xff] %vm788_vm1, %v1268_v1  ;;  %1289 = vrcp.f32 %v700_v0 }
  0xf6   : > { %v1272_v56 = vpop.eup %1271  ;;  %818 = vst.msk [vmem:[#allocation2 + $0xe8] sm:$0xff] %vm788_vm1, %v1270_v53  ;;  %1291 = vrcp.f32 %v703_v52 }
  0xf7   : > { %v1274_v2 = vpop.eup %1273  ;;  %v702_v57 = vadd.f32 1.0, %v1272_v56 }
  0xf8   : > { %v1276_v58 = vpop.eup %1275  ;;  %v705_v62 = vadd.f32 1.0, %v1274_v2 }
  0xf9   : > { %v1278_v63 = vpop.eup %1277  ;;  %817 = vst.msk [vmem:[#allocation2 + $0xe0] sm:$0xff] %vm788_vm1, %v1276_v58  ;;  %1293 = vrcp.f32 %v702_v57 }
  0xfa   : > { %v1280_v3 = vpop.eup %1279  ;;  %820 = vst.msk [vmem:[#allocation2 + $0xf8] sm:$0xff] %vm788_vm1, %v1278_v63  ;;  %1295 = vrcp.f32 %v705_v62 }
  0xfb   : > { %v1282_v4 = vpop.eup %1281  ;;  %v704_v5 = vadd.f32 1.0, %v1280_v3 }
  0xfc   : > { %v1284_v6 = vpop.eup %1283  ;;  %v707_v7 = vadd.f32 1.0, %v1282_v4 }
  0xfd   : > { %v1286_v8 = vpop.eup %1285  ;;  %819 = vst.msk [vmem:[#allocation2 + $0xf0] sm:$0xff] %vm788_vm1, %v1284_v6  ;;  %1297 = vrcp.f32 %v704_v5 }
  0xfe   : > { %v1288_v9 = vpop.eup %1287  ;;  %1299 = vrcp.f32 %v707_v7  ;;  %v706_v10 = vadd.f32 1.0, %v1286_v8 }
  0xff   : > { %v1290_v11 = vpop.eup %1289  ;;  %822 = vst.msk [vmem:[#allocation2 + $0x108] sm:$0xff] %vm788_vm1, %v1288_v9 }
 0x100   : > { %v1292_v12 = vpop.eup %1291  ;;  %821 = vst.msk [vmem:[#allocation2 + $0x100] sm:$0xff] %vm788_vm1, %v1290_v11  ;;  %1301 = vrcp.f32 %v706_v10 }
 0x101   : > { %824 = vst.msk [vmem:[#allocation2 + $0x118] sm:$0xff] %vm788_vm1, %v1292_v12 }
 0x103   : > { %v1294_v13 = vpop.eup %1293 }
 0x104   : > { %v1296_v14 = vpop.eup %1295  ;;  %823 = vst.msk [vmem:[#allocation2 + $0x110] sm:$0xff] %vm788_vm1, %v1294_v13 }
 0x105   : > { %826 = vst.msk [vmem:[#allocation2 + $0x128] sm:$0xff] %vm788_vm1, %v1296_v14 }
 0x107   : > { %v1298_v15 = vpop.eup %1297 }
 0x108   : > { %v1300_v16 = vpop.eup %1299  ;;  %825 = vst.msk [vmem:[#allocation2 + $0x120] sm:$0xff] %vm788_vm1, %v1298_v15 }
 0x109   : > { %828 = vst.msk [vmem:[#allocation2 + $0x138] sm:$0xff] %vm788_vm1, %v1300_v16 }
 0x10a   : > { %v1302_v17 = vpop.eup %1301 }
 0x10b   : > { %827 = vst.msk [vmem:[#allocation2 + $0x130] sm:$0xff] %vm788_vm1, %v1302_v17 }
 0x10c PF: > { %s829_s29 = smul.u32 80, %s1319_s15  ;;  %v1329_v18 = vmov 0   ;;  %v845_v29 = vld [vmem:[%s1379_s23 + $0x20] sm:$0xff]  ;;  %v846_v30 = vld [vmem:[%s1379_s23 + $0x28] sm:$0xff]  ;;  %vm932_vm2 = vcmask 556032   ;;  %v847_v39 = vld [vmem:[%s1379_s23 + $0x30] sm:$0xff] }
 0x10d   : > { %1304 = vset.pattern.permute.xlu1 %v1329_v18  ;;  %1303 = vset.pattern.permute.xlu0 %v1329_v18  ;;  %v841_v31 = vld [vmem:[%s1379_s23] sm:$0xff]  ;;  %v842_v32 = vld [vmem:[%s1379_s23 + $0x8] sm:$0xff]  ;;  %v848_v40 = vld [vmem:[%s1379_s23 + $0x38] sm:$0xff] }
 0x10e   : > { %s830_s30 = scalar_lea.vmem [#allocation2], %s829_s29  ;;  %v843_v41 = vld [vmem:[%s1379_s23 + $0x10] sm:$0xff]  ;;  %v844_v42 = vld [vmem:[%s1379_s23 + $0x18] sm:$0xff]  ;;  %v849_v51 = vld [vmem:[%s1379_s23 + $0x40] sm:$0xff] }
 0x10f   : > { %v851_v49 = vld [vmem:[%s1379_s23 + $0x50] sm:$0xff]  ;;  %v852_v50 = vld [vmem:[%s1379_s23 + $0x58] sm:$0xff]  ;;  %v850_v54 = vld [vmem:[%s1379_s23 + $0x48] sm:$0xff] }
 0x110   : > { %v855_v52 = vld [vmem:[%s1379_s23 + $0x70] sm:$0xff]  ;;  %v856_v53 = vld [vmem:[%s1379_s23 + $0x78] sm:$0xff]  ;;  %v853_v56 = vld [vmem:[%s1379_s23 + $0x60] sm:$0xff] }
 0x111   : > { %v854_v2 = vld [vmem:[%s1379_s23 + $0x68] sm:$0xff]  ;;  %v859_v5 = vld [vmem:[%s1379_s23 + $0x90] sm:$0xff]  ;;  %v860_v6 = vld [vmem:[%s1379_s23 + $0x98] sm:$0xff] }
 0x112   : > { %v833_v19 = vld [vmem:[%s830_s30 + $0x10] sm:$0xff]  ;;  %v831_v20 = vld [vmem:[%s830_s30] sm:$0xff]  ;;  %v834_v21 = vld [vmem:[%s830_s30 + $0x18] sm:$0xff] }
 0x113   : > { %873 = vperm.xlu1 %1304, %v833_v19   ;;  %863 = vperm.xlu0 %1303, %v831_v20   ;;  %v832_v22 = vld [vmem:[%s830_s30 + $0x8] sm:$0xff]  ;;  %v835_v24 = vld [vmem:[%s830_s30 + $0x20] sm:$0xff]  ;;  %v838_v25 = vld [vmem:[%s830_s30 + $0x38] sm:$0xff] }
 0x114   : > { %v836_v23 = vld [vmem:[%s830_s30 + $0x28] sm:$0xff]  ;;  %v837_v26 = vld [vmem:[%s830_s30 + $0x30] sm:$0xff]  ;;  %v839_v28 = vld [vmem:[%s830_s30 + $0x40] sm:$0xff] }
 0x115   : > { %v840_v27 = vld [vmem:[%s830_s30 + $0x48] sm:$0xff]  ;;  %v857_v7 = vld [vmem:[%s1379_s23 + $0x80] sm:$0xff] }
 0x116   : > { %v858_v8 = vld [vmem:[%s1379_s23 + $0x88] sm:$0xff] }
 0x117   : > { %878 = vperm.xlu1 %1304, %v834_v21   ;;  %868 = vperm.xlu0 %1303, %v832_v22  }
 0x11b   : > { %888 = vperm.xlu1 %1304, %v836_v23   ;;  %883 = vperm.xlu0 %1303, %v835_v24  }
 0x11f   : > { %898 = vperm.xlu1 %1304, %v838_v25   ;;  %893 = vperm.xlu0 %1303, %v837_v26  }
 0x123   : > { %908 = vperm.xlu1 %1304, %v840_v27   ;;  %903 = vperm.xlu0 %1303, %v839_v28  }
 0x192   : > { %v874_v33 = vpop.permute.xlu1 %873  ;;  %v864_v34 = vpop.permute.xlu0 %863 }
 0x193   : > { %v915_v35 = vmul.f32 %v874_v33, %v845_v29  ;;  %v916_v36 = vmul.f32 %v874_v33, %v846_v30  ;;  %v911_v37 = vmul.f32 %v864_v34, %v841_v31  ;;  %v912_v38 = vmul.f32 %v864_v34, %v842_v32 }
 0x195   : > { %936 = vst [vmem:[%s1384_s26 + $0x20] sm:$0xff] %v915_v35  ;;  %937 = vst.msk [vmem:[%s1384_s26 + $0x28] sm:$0xff] %vm932_vm2, %v916_v36 }
 0x196   : > { %931 = vst [vmem:[%s1384_s26] sm:$0xff] %v911_v37  ;;  %933 = vst.msk [vmem:[%s1384_s26 + $0x8] sm:$0xff] %vm932_vm2, %v912_v38  ;;  %v879_v43 = vpop.permute.xlu1 %878  ;;  %v869_v44 = vpop.permute.xlu0 %868 }
 0x197   : > { %v917_v45 = vmul.f32 %v879_v43, %v847_v39  ;;  %v918_v46 = vmul.f32 %v879_v43, %v848_v40  ;;  %v913_v47 = vmul.f32 %v869_v44, %v843_v41  ;;  %v914_v48 = vmul.f32 %v869_v44, %v844_v42 }
 0x199   : > { %938 = vst [vmem:[%s1384_s26 + $0x30] sm:$0xff] %v917_v45  ;;  %939 = vst.msk [vmem:[%s1384_s26 + $0x38] sm:$0xff] %vm932_vm2, %v918_v46 }
 0x19a   : > { %934 = vst [vmem:[%s1384_s26 + $0x10] sm:$0xff] %v913_v47  ;;  %935 = vst.msk [vmem:[%s1384_s26 + $0x18] sm:$0xff] %vm932_vm2, %v914_v48  ;;  %v889_v55 = vpop.permute.xlu1 %888  ;;  %v884_v59 = vpop.permute.xlu0 %883 }
 0x19b   : > { %v921_v60 = vmul.f32 %v889_v55, %v851_v49  ;;  %v922_v61 = vmul.f32 %v889_v55, %v852_v50  ;;  %v919_v0 = vmul.f32 %v884_v59, %v849_v51  ;;  %v920_v1 = vmul.f32 %v884_v59, %v850_v54 }
 0x19d   : > { %942 = vst [vmem:[%s1384_s26 + $0x50] sm:$0xff] %v921_v60  ;;  %943 = vst.msk [vmem:[%s1384_s26 + $0x58] sm:$0xff] %vm932_vm2, %v922_v61 }
 0x19e   : > { %940 = vst [vmem:[%s1384_s26 + $0x40] sm:$0xff] %v919_v0  ;;  %941 = vst.msk [vmem:[%s1384_s26 + $0x48] sm:$0xff] %vm932_vm2, %v920_v1  ;;  %v899_v57 = vpop.permute.xlu1 %898  ;;  %v894_v58 = vpop.permute.xlu0 %893 }
 0x19f   : > { %v925_v62 = vmul.f32 %v899_v57, %v855_v52  ;;  %v926_v63 = vmul.f32 %v899_v57, %v856_v53  ;;  %v923_v3 = vmul.f32 %v894_v58, %v853_v56  ;;  %v924_v4 = vmul.f32 %v894_v58, %v854_v2 }
 0x1a1   : > { %946 = vst [vmem:[%s1384_s26 + $0x70] sm:$0xff] %v925_v62  ;;  %947 = vst.msk [vmem:[%s1384_s26 + $0x78] sm:$0xff] %vm932_vm2, %v926_v63 }
 0x1a2   : > { %944 = vst [vmem:[%s1384_s26 + $0x60] sm:$0xff] %v923_v3  ;;  %945 = vst.msk [vmem:[%s1384_s26 + $0x68] sm:$0xff] %vm932_vm2, %v924_v4  ;;  %v909_v9 = vpop.permute.xlu1 %908  ;;  %v904_v10 = vpop.permute.xlu0 %903 }
 0x1a3   : > { %v929_v11 = vmul.f32 %v909_v9, %v859_v5  ;;  %v930_v12 = vmul.f32 %v909_v9, %v860_v6  ;;  %v927_v13 = vmul.f32 %v904_v10, %v857_v7  ;;  %v928_v14 = vmul.f32 %v904_v10, %v858_v8 }
 0x1a5   : > { %950 = vst [vmem:[%s1384_s26 + $0x90] sm:$0xff] %v929_v11  ;;  %951 = vst.msk [vmem:[%s1384_s26 + $0x98] sm:$0xff] %vm932_vm2, %v930_v12 }
 0x1a6   : > { %948 = vst [vmem:[%s1384_s26 + $0x80] sm:$0xff] %v927_v13  ;;  %949 = vst.msk [vmem:[%s1384_s26 + $0x88] sm:$0xff] %vm932_vm2, %v928_v14 }
 0x1a7 PF: > { %s14_s17 = sadd.s32 1, %s1327_s17   ;;  %s1841_s15 = smov %s1323_s16 }
 0x1a8   : > { %p11_p6 = scmp.ge.s32.totalorder %s14_s17, 6   ;;  %s1842_s16 = smov %s1844_s18 }
 0x1aa   :  { %13 = sbr.rel (!%p11_p6) target bundleno = 2 (0x2), region = 74 }

</bundles_post_ra>
